<compile_context>
chip_gen: v7x
topology: tpu7x:2x2x1
jax: 0.10.0
libtpu: 0.0.40
codegen_flags: <defaults>
</compile_context>

<pallas_src>
import functools

import jax
import jax.numpy as jnp
from jax.experimental import pallas as pl
from jax.experimental.pallas import tpu as pltpu


# ---------------------------------------------------------------------------
# Kernel: one grid step = one batch element, channels-major (C, H*W) layout.
# ---------------------------------------------------------------------------
def _block_kernel(x_ref, w_ref, m_ref, g_ref, p_ref, o_ref, *, H, W,
                  num_groups):
    HW = H * W
    Cout = o_ref.shape[1]
    cpg = Cout // num_groups

    x = x_ref[0].astype(jnp.float32)          # (Cin, HW), lane-dense
    masks = m_ref[...]                        # (9, HW) f32 {0,1} boundary masks
    params = p_ref[0]                         # (Cout, 3) f32: [bias | A | B]
    bias_c = params[:, 0:1]                   # (Cout, 1)
    a_c = params[:, 1:2]                      # gamma*(scale+1)
    b_c = params[:, 2:3]                      # beta*(scale+1)+shift

    # --- Conv2d(3x3, pad=1): 9 accumulated bf16 matmuls --------------------
    # Each tap = XLU lane-roll of the flattened image; zero padding handled by
    # multiplying with the precomputed (1, HW) boundary mask (f32, then cast).
    acc = jnp.zeros((Cout, HW), jnp.float32)
    t = 0
    for dh in (-1, 0, 1):
        for dw in (-1, 0, 1):
            s = dh * W + dw                                  # flat spatial shift
            shifted = x if s == 0 else pltpu.roll(x, (-s) % HW, axis=1)
            tap = (shifted * masks[t:t + 1, :]).astype(jnp.bfloat16)
            w_t = w_ref[t].astype(jnp.bfloat16)              # (Cout, Cin)
            acc = acc + jnp.dot(w_t, tap,
                                preferred_element_type=jnp.float32)
            t += 1
    acc = acc + bias_c                                       # conv bias

    # --- GroupNorm (eps = 1e-5), two-pass, lane reduce FIRST ----------------
    # Lane (HW) reduction to (Cout, 1), then block-diagonal 0/1 gmat matmul on
    # that column aggregates channels within each group (Cout^2 FLOPs).
    inv_n = 1.0 / (cpg * HW)
    gmat = g_ref[...]                                        # (Cout, Cout) f32
    ch_sum = jnp.sum(acc, axis=1, keepdims=True)             # (Cout, 1)
    mean_c = jnp.dot(gmat, ch_sum,
                     preferred_element_type=jnp.float32) * inv_n
    cen = acc - mean_c
    ch_sq = jnp.sum(cen * cen, axis=1, keepdims=True)        # (Cout, 1)
    var_c = jnp.dot(gmat, ch_sq,
                    preferred_element_type=jnp.float32) * inv_n
    xn = cen * jax.lax.rsqrt(var_c + 1e-5)                   # (Cout, HW)

    # Folded affine (gamma/beta/scale/shift) + SiLU; Dropout(p=0) == identity.
    y = xn * a_c + b_c
    y = y * jax.nn.sigmoid(y)                 # SiLU: single EUP transcendental
    o_ref[0] = y.astype(o_ref.dtype)          # lane-dense store: (Cout, HW)


# ---------------------------------------------------------------------------
# Wrapper: NCHW in / NCHW out with *reshapes only* (no transposes, no pad of
# the activations; only tiny per-call XLA work on weights/params/constants).
# ---------------------------------------------------------------------------
def block_forward(x_nchw, w_hwio, bias, gamma, beta,
                  scale=None, shift=None, *, num_groups):
    N, Cin, H, W = x_nchw.shape
    Cout = w_hwio.shape[-1]
    assert w_hwio.shape[:3] == (3, 3, Cin), "expected HWIO 3x3 weights"
    assert Cout % num_groups == 0, "Cout must be divisible by num_groups"
    HW = H * W
    dtype = x_nchw.dtype
    has_ss = scale is not None
    if has_ss:
        assert shift is not None

    # NCHW -> (N, C, H*W): a free reshape (no HBM transpose pass).
    x2 = x_nchw.reshape(N, Cin, HW)

    # Weight standardization (WeightStandardizedConv2d): per output channel,
    # mean/var (unbiased=False) over (kh, kw, Cin), eps = 1e-5.
    w_mean = jnp.mean(w_hwio, axis=(0, 1, 2), keepdims=True)
    w_var = jnp.mean((w_hwio - w_mean) ** 2, axis=(0, 1, 2), keepdims=True)
    w_std = (w_hwio - w_mean) * jax.lax.rsqrt(w_var + 1e-5)
    # (kh, kw, ci, co) -> (tap, co, ci): kernel does acc += W_t @ tap_t.
    w_taps = jnp.transpose(w_std, (0, 1, 3, 2)).reshape(
        9, Cout, Cin).astype(jnp.float32)

    # Grid-invariant constants, precomputed once (constant index_map => the
    # pipeline DMAs them a single time).
    pos = jnp.arange(HW, dtype=jnp.int32)
    hh, ww = pos // W, pos % W
    mask_rows = []
    for dh in (-1, 0, 1):
        for dw in (-1, 0, 1):
            valid = ((hh + dh >= 0) & (hh + dh < H) &
                     (ww + dw >= 0) & (ww + dw < W))
            mask_rows.append(valid)
    masks = jnp.stack(mask_rows, axis=0).astype(jnp.float32)       # (9, HW)

    cpg = Cout // num_groups
    gidx = jnp.arange(Cout) // cpg
    gmat = (gidx[:, None] == gidx[None, :]).astype(jnp.float32)    # (Cout, Cout)

    # Fold GroupNorm affine and optional ResNet scale_shift: y = xn*A + B.
    if has_ss:
        A = gamma[None, :] * (scale + 1.0)                         # (N, Cout)
        B = beta[None, :] * (scale + 1.0) + shift
    else:
        A = gamma[None, :]                                         # (1, Cout)
        B = beta[None, :]
    Np = A.shape[0]
    params = jnp.stack(
        [jnp.broadcast_to(bias[None, :], (Np, Cout)), A, B], axis=-1
    ).astype(jnp.float32)                                          # (Np, Cout, 3)

    kernel = functools.partial(_block_kernel, H=H, W=W, num_groups=num_groups)
    p_map = (lambda n: (n, 0, 0)) if has_ss else (lambda n: (0, 0, 0))

    out = pl.pallas_call(
        kernel,
        out_shape=jax.ShapeDtypeStruct((N, Cout, HW), dtype),
        grid_spec=pltpu.PrefetchScalarGridSpec(
            num_scalar_prefetch=0,
            grid=(N,),
            in_specs=[
                pl.BlockSpec((1, Cin, HW), lambda n: (n, 0, 0)),    # activations
                pl.BlockSpec((9, Cout, Cin), lambda n: (0, 0, 0)),  # conv taps
                pl.BlockSpec((9, HW), lambda n: (0, 0)),            # boundary masks
                pl.BlockSpec((Cout, Cout), lambda n: (0, 0)),       # group matrix
                pl.BlockSpec((1, Cout, 3), p_map),                  # bias|A|B packed
            ],
            out_specs=pl.BlockSpec((1, Cout, HW), lambda n: (n, 0, 0)),
        ),
        compiler_params=pltpu.CompilerParams(
            dimension_semantics=("parallel",)),
    )(x2, w_taps, masks, gmat, params)

    # (N, Cout, H*W) -> NCHW: again a free reshape, no transpose.
    return out.reshape(N, Cout, H, W)


# ---------------------------------------------------------------------------
# Pure-JAX reference for correctness checking.
# ---------------------------------------------------------------------------
def block_reference(x_nchw, w_hwio, bias, gamma, beta, scale, shift,
                    *, num_groups):
    w_mean = jnp.mean(w_hwio, axis=(0, 1, 2), keepdims=True)
    w_var = jnp.mean((w_hwio - w_mean) ** 2, axis=(0, 1, 2), keepdims=True)
    w_std = (w_hwio - w_mean) * jax.lax.rsqrt(w_var + 1e-5)

    x = jnp.transpose(x_nchw, (0, 2, 3, 1))
    y = jax.lax.conv_general_dilated(
        x, w_std, window_strides=(1, 1), padding="SAME",
        dimension_numbers=("NHWC", "HWIO", "NHWC")) + bias

    N, H, W, C = y.shape
    cpg = C // num_groups
    yg = y.reshape(N, H * W, num_groups, cpg)
    m = jnp.mean(yg, axis=(1, 3), keepdims=True)
    v = jnp.mean((yg - m) ** 2, axis=(1, 3), keepdims=True)
    yn = ((yg - m) * jax.lax.rsqrt(v + 1e-5)).reshape(N, H, W, C)
    yn = yn * gamma + beta
    yn = yn * (scale[:, None, None, :] + 1.0) + shift[:, None, None, :]
    yn = yn * jax.nn.sigmoid(yn)
    return jnp.transpose(yn, (0, 3, 1, 2))


if __name__ == "__main__":
    # Shapes consistent with Block(dim=4, dim_out=8, activation=SiLU,
    # norm_groups=4, dropout=0.0): input NCHW = [2, 4, 16, 16].
    N, Cin, H, W = 2, 4, 16, 16
    Cout, num_groups = 8, 4

    key = jax.random.PRNGKey(0)
    k_x, k_w, k_b, k_g, k_bt, k_sc, k_sh = jax.random.split(key, 7)

    x = jax.random.normal(k_x, (N, Cin, H, W), jnp.float32)
    w = jax.random.normal(k_w, (3, 3, Cin, Cout), jnp.float32) * 0.1   # HWIO
    bias = jax.random.normal(k_b, (Cout,), jnp.float32) * 0.1
    gamma = 1.0 + 0.1 * jax.random.normal(k_g, (Cout,), jnp.float32)
    beta = 0.1 * jax.random.normal(k_bt, (Cout,), jnp.float32)
    # time-embedding scale/shift (shape [N, Cout, 1, 1] in PyTorch, squeezed)
    scale = 0.1 * jax.random.normal(k_sc, (N, Cout), jnp.float32)
    shift = 0.1 * jax.random.normal(k_sh, (N, Cout), jnp.float32)

    fwd = jax.jit(functools.partial(block_forward, num_groups=num_groups))

    # scale_shift path
    out = jax.block_until_ready(fwd(x, w, bias, gamma, beta, scale, shift))
    ref = jax.block_until_ready(
        block_reference(x, w, bias, gamma, beta, scale, shift,
                        num_groups=num_groups))
    assert out.shape == (N, Cout, H, W)
    max_err = float(jnp.max(jnp.abs(out - ref)))
    # bf16 MXU operands (f32 accumulation) -> relaxed tolerance vs pure f32.
    assert jnp.allclose(out, ref, atol=5e-2, rtol=5e-2), max_err

    # no-scale_shift path (exercises the static has_scale_shift flag)
    out2 = jax.block_until_ready(fwd(x, w, bias, gamma, beta))
    zeros = jnp.zeros((N, Cout), jnp.float32)
    ref2 = jax.block_until_ready(
        block_reference(x, w, bias, gamma, beta, zeros, zeros,
                        num_groups=num_groups))
    max_err2 = float(jnp.max(jnp.abs(out2 - ref2)))
    assert jnp.allclose(out2, ref2, atol=5e-2, rtol=5e-2), max_err2

    print("KERNEL_OK")
</pallas_src>

<mosaic_0001>
module attributes {stable_mosaic.version = 11 : i64} {
  func.func @_block_kernel(%arg0: i32, %arg1: memref<1x4x256xf32, #tpu.memory_space<vmem>>, %arg2: memref<9x8x4xf32, #tpu.memory_space<vmem>>, %arg3: memref<9x256xf32, #tpu.memory_space<vmem>>, %arg4: memref<8x8xf32, #tpu.memory_space<vmem>>, %arg5: memref<1x8x3xf32, #tpu.memory_space<vmem>>, %arg6: memref<1x8x256xf32, #tpu.memory_space<vmem>>) attributes {dimension_semantics = [#tpu.dimension_semantics<parallel>], iteration_bounds = array<i64: 2>, scalar_prefetch = 0 : i64, scratch_operands = 0 : i64, tpu.core_type = #tpu.core_type<tc>, window_params = [{transform_indices = @transform_0, window_bounds = array<i64: 1, 4, 256>}, {pipeline_mode = #tpu.pipeline_mode<synchronous>, transform_indices = @transform_1, window_bounds = array<i64: 9, 8, 4>}, {pipeline_mode = #tpu.pipeline_mode<synchronous>, transform_indices = @transform_2, window_bounds = array<i64: 9, 256>}, {pipeline_mode = #tpu.pipeline_mode<synchronous>, transform_indices = @transform_3, window_bounds = array<i64: 8, 8>}, {transform_indices = @transform_4, window_bounds = array<i64: 1, 8, 3>}, {transform_indices = @transform_5, window_bounds = array<i64: 1, 8, 256>}]} {
    %c0 = arith.constant 0 : index
    %c0_0 = arith.constant 0 : index
    %c0_1 = arith.constant 0 : index
    %0 = vector.load %arg1[%c0, %c0_0, %c0_1] : memref<1x4x256xf32, #tpu.memory_space<vmem>>, vector<1x4x256xf32>
    %1 = vector.shape_cast %0 : vector<1x4x256xf32> to vector<4x256xf32>
    %c0_2 = arith.constant 0 : index
    %c0_3 = arith.constant 0 : index
    %2 = vector.load %arg3[%c0_2, %c0_3] : memref<9x256xf32, #tpu.memory_space<vmem>>, vector<9x256xf32>
    %c0_4 = arith.constant 0 : index
    %c0_5 = arith.constant 0 : index
    %c0_6 = arith.constant 0 : index
    %3 = vector.load %arg5[%c0_4, %c0_5, %c0_6] : memref<1x8x3xf32, #tpu.memory_space<vmem>>, vector<1x8x3xf32>
    %4 = vector.shape_cast %3 : vector<1x8x3xf32> to vector<8x3xf32>
    %5 = vector.extract_strided_slice %4 {offsets = [0, 0], sizes = [8, 1], strides = [1, 1]} : vector<8x3xf32> to vector<8x1xf32>
    %6 = vector.extract_strided_slice %4 {offsets = [0, 1], sizes = [8, 1], strides = [1, 1]} : vector<8x3xf32> to vector<8x1xf32>
    %7 = vector.extract_strided_slice %4 {offsets = [0, 2], sizes = [8, 1], strides = [1, 1]} : vector<8x3xf32> to vector<8x1xf32>
    %cst = arith.constant 0.000000e+00 : f32
    %8 = vector.broadcast %cst : f32 to vector<8x256xf32>
    %c17_i32 = arith.constant 17 : i32
    %9 = tpu.dynamic_rotate %1 by %c17_i32 dim 1 : vector<4x256xf32>, i32 -> vector<4x256xf32>
    %10 = vector.extract_strided_slice %2 {offsets = [0, 0], sizes = [1, 256], strides = [1, 1]} : vector<9x256xf32> to vector<1x256xf32>
    %11 = vector.broadcast %10 : vector<1x256xf32> to vector<4x256xf32>
    %12 = arith.mulf %9, %11 : vector<4x256xf32>
    %13 = arith.truncf %12 : vector<4x256xf32> to vector<4x256xbf16>
    %c0_7 = arith.constant 0 : index
    %c0_8 = arith.constant 0 : index
    %c0_9 = arith.constant 0 : index
    %14 = vector.load %arg2[%c0_7, %c0_8, %c0_9] : memref<9x8x4xf32, #tpu.memory_space<vmem>>, vector<1x8x4xf32>
    %15 = vector.shape_cast %14 : vector<1x8x4xf32> to vector<8x4xf32>
    %16 = arith.truncf %15 : vector<8x4xf32> to vector<8x4xbf16>
    %cst_10 = arith.constant dense<0.000000e+00> : vector<8x256xf32>
    %17 = tpu.matmul %16, %13, %cst_10 {dimension_numbers = #tpu.dot_dimension_numbers<[1], [0], [0], [1], [0, 0, 1, 1], [], []>} : vector<8x4xbf16>, vector<4x256xbf16>, vector<8x256xf32> -> vector<8x256xf32>
    %18 = arith.addf %8, %17 : vector<8x256xf32>
    %c16_i32 = arith.constant 16 : i32
    %19 = tpu.dynamic_rotate %1 by %c16_i32 dim 1 : vector<4x256xf32>, i32 -> vector<4x256xf32>
    %20 = vector.extract_strided_slice %2 {offsets = [1, 0], sizes = [1, 256], strides = [1, 1]} : vector<9x256xf32> to vector<1x256xf32>
    %21 = vector.broadcast %20 : vector<1x256xf32> to vector<4x256xf32>
    %22 = arith.mulf %19, %21 : vector<4x256xf32>
    %23 = arith.truncf %22 : vector<4x256xf32> to vector<4x256xbf16>
    %c1 = arith.constant 1 : index
    %c0_11 = arith.constant 0 : index
    %c0_12 = arith.constant 0 : index
    %24 = vector.load %arg2[%c1, %c0_11, %c0_12] : memref<9x8x4xf32, #tpu.memory_space<vmem>>, vector<1x8x4xf32>
    %25 = vector.shape_cast %24 : vector<1x8x4xf32> to vector<8x4xf32>
    %26 = arith.truncf %25 : vector<8x4xf32> to vector<8x4xbf16>
    %cst_13 = arith.constant dense<0.000000e+00> : vector<8x256xf32>
    %27 = tpu.matmul %26, %23, %cst_13 {dimension_numbers = #tpu.dot_dimension_numbers<[1], [0], [0], [1], [0, 0, 1, 1], [], []>} : vector<8x4xbf16>, vector<4x256xbf16>, vector<8x256xf32> -> vector<8x256xf32>
    %28 = arith.addf %18, %27 : vector<8x256xf32>
    %c15_i32 = arith.constant 15 : i32
    %29 = tpu.dynamic_rotate %1 by %c15_i32 dim 1 : vector<4x256xf32>, i32 -> vector<4x256xf32>
    %30 = vector.extract_strided_slice %2 {offsets = [2, 0], sizes = [1, 256], strides = [1, 1]} : vector<9x256xf32> to vector<1x256xf32>
    %31 = vector.broadcast %30 : vector<1x256xf32> to vector<4x256xf32>
    %32 = arith.mulf %29, %31 : vector<4x256xf32>
    %33 = arith.truncf %32 : vector<4x256xf32> to vector<4x256xbf16>
    %c2 = arith.constant 2 : index
    %c0_14 = arith.constant 0 : index
    %c0_15 = arith.constant 0 : index
    %34 = vector.load %arg2[%c2, %c0_14, %c0_15] : memref<9x8x4xf32, #tpu.memory_space<vmem>>, vector<1x8x4xf32>
    %35 = vector.shape_cast %34 : vector<1x8x4xf32> to vector<8x4xf32>
    %36 = arith.truncf %35 : vector<8x4xf32> to vector<8x4xbf16>
    %cst_16 = arith.constant dense<0.000000e+00> : vector<8x256xf32>
    %37 = tpu.matmul %36, %33, %cst_16 {dimension_numbers = #tpu.dot_dimension_numbers<[1], [0], [0], [1], [0, 0, 1, 1], [], []>} : vector<8x4xbf16>, vector<4x256xbf16>, vector<8x256xf32> -> vector<8x256xf32>
    %38 = arith.addf %28, %37 : vector<8x256xf32>
    %c1_i32 = arith.constant 1 : i32
    %39 = tpu.dynamic_rotate %1 by %c1_i32 dim 1 : vector<4x256xf32>, i32 -> vector<4x256xf32>
    %40 = vector.extract_strided_slice %2 {offsets = [3, 0], sizes = [1, 256], strides = [1, 1]} : vector<9x256xf32> to vector<1x256xf32>
    %41 = vector.broadcast %40 : vector<1x256xf32> to vector<4x256xf32>
    %42 = arith.mulf %39, %41 : vector<4x256xf32>
    %43 = arith.truncf %42 : vector<4x256xf32> to vector<4x256xbf16>
    %c3 = arith.constant 3 : index
    %c0_17 = arith.constant 0 : index
    %c0_18 = arith.constant 0 : index
    %44 = vector.load %arg2[%c3, %c0_17, %c0_18] : memref<9x8x4xf32, #tpu.memory_space<vmem>>, vector<1x8x4xf32>
    %45 = vector.shape_cast %44 : vector<1x8x4xf32> to vector<8x4xf32>
    %46 = arith.truncf %45 : vector<8x4xf32> to vector<8x4xbf16>
    %cst_19 = arith.constant dense<0.000000e+00> : vector<8x256xf32>
    %47 = tpu.matmul %46, %43, %cst_19 {dimension_numbers = #tpu.dot_dimension_numbers<[1], [0], [0], [1], [0, 0, 1, 1], [], []>} : vector<8x4xbf16>, vector<4x256xbf16>, vector<8x256xf32> -> vector<8x256xf32>
    %48 = arith.addf %38, %47 : vector<8x256xf32>
    %49 = vector.extract_strided_slice %2 {offsets = [4, 0], sizes = [1, 256], strides = [1, 1]} : vector<9x256xf32> to vector<1x256xf32>
    %50 = vector.broadcast %49 : vector<1x256xf32> to vector<4x256xf32>
    %51 = arith.mulf %1, %50 : vector<4x256xf32>
    %52 = arith.truncf %51 : vector<4x256xf32> to vector<4x256xbf16>
    %c4 = arith.constant 4 : index
    %c0_20 = arith.constant 0 : index
    %c0_21 = arith.constant 0 : index
    %53 = vector.load %arg2[%c4, %c0_20, %c0_21] : memref<9x8x4xf32, #tpu.memory_space<vmem>>, vector<1x8x4xf32>
    %54 = vector.shape_cast %53 : vector<1x8x4xf32> to vector<8x4xf32>
    %55 = arith.truncf %54 : vector<8x4xf32> to vector<8x4xbf16>
    %cst_22 = arith.constant dense<0.000000e+00> : vector<8x256xf32>
    %56 = tpu.matmul %55, %52, %cst_22 {dimension_numbers = #tpu.dot_dimension_numbers<[1], [0], [0], [1], [0, 0, 1, 1], [], []>} : vector<8x4xbf16>, vector<4x256xbf16>, vector<8x256xf32> -> vector<8x256xf32>
    %57 = arith.addf %48, %56 : vector<8x256xf32>
    %c255_i32 = arith.constant 255 : i32
    %58 = tpu.dynamic_rotate %1 by %c255_i32 dim 1 : vector<4x256xf32>, i32 -> vector<4x256xf32>
    %59 = vector.extract_strided_slice %2 {offsets = [5, 0], sizes = [1, 256], strides = [1, 1]} : vector<9x256xf32> to vector<1x256xf32>
    %60 = vector.broadcast %59 : vector<1x256xf32> to vector<4x256xf32>
    %61 = arith.mulf %58, %60 : vector<4x256xf32>
    %62 = arith.truncf %61 : vector<4x256xf32> to vector<4x256xbf16>
    %c5 = arith.constant 5 : index
    %c0_23 = arith.constant 0 : index
    %c0_24 = arith.constant 0 : index
    %63 = vector.load %arg2[%c5, %c0_23, %c0_24] : memref<9x8x4xf32, #tpu.memory_space<vmem>>, vector<1x8x4xf32>
    %64 = vector.shape_cast %63 : vector<1x8x4xf32> to vector<8x4xf32>
    %65 = arith.truncf %64 : vector<8x4xf32> to vector<8x4xbf16>
    %cst_25 = arith.constant dense<0.000000e+00> : vector<8x256xf32>
    %66 = tpu.matmul %65, %62, %cst_25 {dimension_numbers = #tpu.dot_dimension_numbers<[1], [0], [0], [1], [0, 0, 1, 1], [], []>} : vector<8x4xbf16>, vector<4x256xbf16>, vector<8x256xf32> -> vector<8x256xf32>
    %67 = arith.addf %57, %66 : vector<8x256xf32>
    %c241_i32 = arith.constant 241 : i32
    %68 = tpu.dynamic_rotate %1 by %c241_i32 dim 1 : vector<4x256xf32>, i32 -> vector<4x256xf32>
    %69 = vector.extract_strided_slice %2 {offsets = [6, 0], sizes = [1, 256], strides = [1, 1]} : vector<9x256xf32> to vector<1x256xf32>
    %70 = vector.broadcast %69 : vector<1x256xf32> to vector<4x256xf32>
    %71 = arith.mulf %68, %70 : vector<4x256xf32>
    %72 = arith.truncf %71 : vector<4x256xf32> to vector<4x256xbf16>
    %c6 = arith.constant 6 : index
    %c0_26 = arith.constant 0 : index
    %c0_27 = arith.constant 0 : index
    %73 = vector.load %arg2[%c6, %c0_26, %c0_27] : memref<9x8x4xf32, #tpu.memory_space<vmem>>, vector<1x8x4xf32>
    %74 = vector.shape_cast %73 : vector<1x8x4xf32> to vector<8x4xf32>
    %75 = arith.truncf %74 : vector<8x4xf32> to vector<8x4xbf16>
    %cst_28 = arith.constant dense<0.000000e+00> : vector<8x256xf32>
    %76 = tpu.matmul %75, %72, %cst_28 {dimension_numbers = #tpu.dot_dimension_numbers<[1], [0], [0], [1], [0, 0, 1, 1], [], []>} : vector<8x4xbf16>, vector<4x256xbf16>, vector<8x256xf32> -> vector<8x256xf32>
    %77 = arith.addf %67, %76 : vector<8x256xf32>
    %c240_i32 = arith.constant 240 : i32
    %78 = tpu.dynamic_rotate %1 by %c240_i32 dim 1 : vector<4x256xf32>, i32 -> vector<4x256xf32>
    %79 = vector.extract_strided_slice %2 {offsets = [7, 0], sizes = [1, 256], strides = [1, 1]} : vector<9x256xf32> to vector<1x256xf32>
    %80 = vector.broadcast %79 : vector<1x256xf32> to vector<4x256xf32>
    %81 = arith.mulf %78, %80 : vector<4x256xf32>
    %82 = arith.truncf %81 : vector<4x256xf32> to vector<4x256xbf16>
    %c7 = arith.constant 7 : index
    %c0_29 = arith.constant 0 : index
    %c0_30 = arith.constant 0 : index
    %83 = vector.load %arg2[%c7, %c0_29, %c0_30] : memref<9x8x4xf32, #tpu.memory_space<vmem>>, vector<1x8x4xf32>
    %84 = vector.shape_cast %83 : vector<1x8x4xf32> to vector<8x4xf32>
    %85 = arith.truncf %84 : vector<8x4xf32> to vector<8x4xbf16>
    %cst_31 = arith.constant dense<0.000000e+00> : vector<8x256xf32>
    %86 = tpu.matmul %85, %82, %cst_31 {dimension_numbers = #tpu.dot_dimension_numbers<[1], [0], [0], [1], [0, 0, 1, 1], [], []>} : vector<8x4xbf16>, vector<4x256xbf16>, vector<8x256xf32> -> vector<8x256xf32>
    %87 = arith.addf %77, %86 : vector<8x256xf32>
    %c239_i32 = arith.constant 239 : i32
    %88 = tpu.dynamic_rotate %1 by %c239_i32 dim 1 : vector<4x256xf32>, i32 -> vector<4x256xf32>
    %89 = vector.extract_strided_slice %2 {offsets = [8, 0], sizes = [1, 256], strides = [1, 1]} : vector<9x256xf32> to vector<1x256xf32>
    %90 = vector.broadcast %89 : vector<1x256xf32> to vector<4x256xf32>
    %91 = arith.mulf %88, %90 : vector<4x256xf32>
    %92 = arith.truncf %91 : vector<4x256xf32> to vector<4x256xbf16>
    %c8 = arith.constant 8 : index
    %c0_32 = arith.constant 0 : index
    %c0_33 = arith.constant 0 : index
    %93 = vector.load %arg2[%c8, %c0_32, %c0_33] : memref<9x8x4xf32, #tpu.memory_space<vmem>>, vector<1x8x4xf32>
    %94 = vector.shape_cast %93 : vector<1x8x4xf32> to vector<8x4xf32>
    %95 = arith.truncf %94 : vector<8x4xf32> to vector<8x4xbf16>
    %cst_34 = arith.constant dense<0.000000e+00> : vector<8x256xf32>
    %96 = tpu.matmul %95, %92, %cst_34 {dimension_numbers = #tpu.dot_dimension_numbers<[1], [0], [0], [1], [0, 0, 1, 1], [], []>} : vector<8x4xbf16>, vector<4x256xbf16>, vector<8x256xf32> -> vector<8x256xf32>
    %97 = arith.addf %87, %96 : vector<8x256xf32>
    %98 = vector.broadcast %5 : vector<8x1xf32> to vector<8x256xf32>
    %99 = arith.addf %97, %98 : vector<8x256xf32>
    %c0_35 = arith.constant 0 : index
    %c0_36 = arith.constant 0 : index
    %100 = vector.load %arg4[%c0_35, %c0_36] : memref<8x8xf32, #tpu.memory_space<vmem>>, vector<8x8xf32>
    %cst_37 = arith.constant dense<0.000000e+00> : vector<8xf32>
    %101 = vector.multi_reduction <add>, %99, %cst_37 [1] : vector<8x256xf32> to vector<8xf32>
    %102 = vector.shape_cast %101 : vector<8xf32> to vector<8x1xf32>
    %cst_38 = arith.constant dense<0.000000e+00> : vector<8x1xf32>
    %103 = tpu.matmul %100, %102, %cst_38 {dimension_numbers = #tpu.dot_dimension_numbers<[1], [0], [0], [1], [0, 0, 1, 1], [], []>} : vector<8x8xf32>, vector<8x1xf32>, vector<8x1xf32> -> vector<8x1xf32>
    %cst_39 = arith.constant 0.001953125 : f32
    %104 = vector.broadcast %cst_39 : f32 to vector<8x1xf32>
    %105 = arith.mulf %103, %104 : vector<8x1xf32>
    %106 = vector.broadcast %105 : vector<8x1xf32> to vector<8x256xf32>
    %107 = arith.subf %99, %106 : vector<8x256xf32>
    %108 = arith.mulf %107, %107 : vector<8x256xf32>
    %cst_40 = arith.constant dense<0.000000e+00> : vector<8xf32>
    %109 = vector.multi_reduction <add>, %108, %cst_40 [1] : vector<8x256xf32> to vector<8xf32>
    %110 = vector.shape_cast %109 : vector<8xf32> to vector<8x1xf32>
    %cst_41 = arith.constant dense<0.000000e+00> : vector<8x1xf32>
    %111 = tpu.matmul %100, %110, %cst_41 {dimension_numbers = #tpu.dot_dimension_numbers<[1], [0], [0], [1], [0, 0, 1, 1], [], []>} : vector<8x8xf32>, vector<8x1xf32>, vector<8x1xf32> -> vector<8x1xf32>
    %cst_42 = arith.constant 0.001953125 : f32
    %112 = vector.broadcast %cst_42 : f32 to vector<8x1xf32>
    %113 = arith.mulf %111, %112 : vector<8x1xf32>
    %cst_43 = arith.constant 9.99999974E-6 : f32
    %114 = vector.broadcast %cst_43 : f32 to vector<8x1xf32>
    %115 = arith.addf %113, %114 : vector<8x1xf32>
    %116 = math.rsqrt %115 : vector<8x1xf32>
    %117 = vector.broadcast %116 : vector<8x1xf32> to vector<8x256xf32>
    %118 = arith.mulf %107, %117 : vector<8x256xf32>
    %119 = vector.broadcast %6 : vector<8x1xf32> to vector<8x256xf32>
    %120 = arith.mulf %118, %119 : vector<8x256xf32>
    %121 = vector.broadcast %7 : vector<8x1xf32> to vector<8x256xf32>
    %122 = arith.addf %120, %121 : vector<8x256xf32>
    %123 = arith.negf %122 : vector<8x256xf32>
    %124 = math.exp %123 : vector<8x256xf32>
    %cst_44 = arith.constant 1.000000e+00 : f32
    %125 = vector.broadcast %cst_44 : f32 to vector<8x256xf32>
    %126 = arith.addf %125, %124 : vector<8x256xf32>
    %127 = arith.divf %125, %126 : vector<8x256xf32>
    %128 = arith.mulf %122, %127 : vector<8x256xf32>
    %c0_45 = arith.constant 0 : index
    %c0_46 = arith.constant 0 : index
    %c0_47 = arith.constant 0 : index
    %129 = vector.load %arg6[%c0_45, %c0_46, %c0_47] : memref<1x8x256xf32, #tpu.memory_space<vmem>>, vector<1x8x256xf32>
    %130 = vector.shape_cast %129 : vector<1x8x256xf32> to vector<8x256xf32>
    %131 = vector.shape_cast %128 : vector<8x256xf32> to vector<1x8x256xf32>
    tpu.vector_store %arg6[%c0_45, %c0_46, %c0_47], %131 {strides = array<i32>} : memref<1x8x256xf32, #tpu.memory_space<vmem>>, vector<1x8x256xf32>,
    return
  }
  func.func @transform_0(%arg0: i32) -> (i32, i32, i32) {
    %c0_i32 = arith.constant 0 : i32
    %c0_i32_0 = arith.constant 0 : i32
    %c0_i32_1 = arith.constant 0 : i32
    return %arg0, %c0_i32, %c0_i32_0 : i32, i32, i32
  }
  func.func @transform_1(%arg0: i32) -> (i32, i32, i32) {
    %c0_i32 = arith.constant 0 : i32
    %c0_i32_0 = arith.constant 0 : i32
    %c0_i32_1 = arith.constant 0 : i32
    %c0_i32_2 = arith.constant 0 : i32
    return %c0_i32, %c0_i32_0, %c0_i32_1 : i32, i32, i32
  }
  func.func @transform_2(%arg0: i32) -> (i32, i32) {
    %c0_i32 = arith.constant 0 : i32
    %c0_i32_0 = arith.constant 0 : i32
    %c0_i32_1 = arith.constant 0 : i32
    return %c0_i32, %c0_i32_0 : i32, i32
  }
  func.func @transform_3(%arg0: i32) -> (i32, i32) {
    %c0_i32 = arith.constant 0 : i32
    %c0_i32_0 = arith.constant 0 : i32
    %c0_i32_1 = arith.constant 0 : i32
    return %c0_i32, %c0_i32_0 : i32, i32
  }
  func.func @transform_4(%arg0: i32) -> (i32, i32, i32) {
    %c0_i32 = arith.constant 0 : i32
    %c0_i32_0 = arith.constant 0 : i32
    %c0_i32_1 = arith.constant 0 : i32
    return %arg0, %c0_i32, %c0_i32_0 : i32, i32, i32
  }
  func.func @transform_5(%arg0: i32) -> (i32, i32, i32) {
    %c0_i32 = arith.constant 0 : i32
    %c0_i32_0 = arith.constant 0 : i32
    %c0_i32_1 = arith.constant 0 : i32
    return %arg0, %c0_i32, %c0_i32_0 : i32, i32, i32
  }
}

</mosaic_0001>

<bundles_post_ra>
// kernel: block_forward.1
= control target key start
LH: loop header
LB: loop body
LE: loop exit
PB: predicated region body
PF: predicated region fallthrough
CT: control target
= control target key end

     0   :  { %s1337_s18 = smov 0   ;;  %s1543_s0 = inlined_call_operand.vmem [shape: f32[2,4,256], index: 0, kind: input, shape index: {}]   ;;  %s1544_s1 = inlined_call_operand.vmem [shape: f32[9,8,4], index: 1, kind: input, shape index: {}]   ;;  %s1545_s2 = inlined_call_operand.vmem [shape: f32[9,256], index: 2, kind: input, shape index: {}]   ;;  %s1546_s3 = inlined_call_operand.vmem [shape: f32[8,8], index: 3, kind: input, shape index: {}]   ;;  %s1547_s4 = inlined_call_operand.vmem [shape: f32[2,8,3], index: 4, kind: input, shape index: {}]   ;;  %s1548_s5 = inlined_call_operand.vmem [shape: f32[2,8,256], index: 5, kind: output, shape index: {}]  }
   0x1 LB: > { %s1189_s19 = sadd.s32 4294967295, %s1292_s18   ;;  %p1193_p0 = scmp.ge.s32.totalorder %s1292_s18, 1  ;;  %s1292_s18 = sphi %s1337_s18, %s15_s18  }
   0x2   : > { %p196_p1 = scmp.lt.s32.totalorder %s1292_s18, 3 }
   0x4   : > { %p197_p2 = pnand %p1193_p0, %p196_p1 }
   0x5   : > { %p228_p3 = scmp.lt.s32.totalorder (!%p197_p2), %s1189_s19, 1  ;;  %v1294_v1 = vmov (!%p197_p2), 0   ;;  %s1295_s24 = smov (!%p197_p2), 17   ;;  %v256_v4 = vlaneseq (!%p197_p2)  ;;  %v1383_v7 = vld [vmem:[%s1545_s2] sm:$0xff] (!%p197_p2)  ;;  %v1388_v8 = vld [vmem:[%s1545_s2 + $0x8] sm:$0xff] (!%p197_p2)  ;;  %vm301_vm2 = vcmask (!%p197_p2), 1041408  }
   0x6   : > { %200 = sbr.rel (%p197_p2) target bundleno = 1422 (0x58e), region = 40  ;;  %340 = vmatprep.mubr.bf16.mxu0 (!%p197_p2), %v1294_v1  ;;  %s1296_s25 = smov (!%p197_p2), 16   ;;  %390 = vmatprep.mubr.bf16.mxu1 (!%p197_p2), %v1294_v1  ;;  %v273_v27 = vld [vmem:[%s1544_s1] sm:$0xff] (!%p197_p2)  ;;  %v1199_v28 = vld [vmem:[%s1544_s1 + $0x8] sm:$0xff] (!%p197_p2)  ;;  %vm297_vm5 = vcmask (!%p197_p2), 31744   ;;  %v1204_v60 = vld [vmem:[%s1544_s1 + $0x10] sm:$0xff] (!%p197_p2) }
   0x7   : > { %1270 = vset.pattern.permute.xlu0 (!%p197_p2), %v1294_v1  ;;  %1271 = vset.pattern.permute.xlu1 (!%p197_p2), %v1294_v1  ;;  %s1297_s26 = smov (!%p197_p2), 15   ;;  %s1298_s27 = smov (!%p197_p2), 1   ;;  %v1377_v5 = vshrl.u32 (!%p197_p2), %v256_v4, 7  ;;  %v1392_v11 = vand.u32 (!%p197_p2), 127, %v256_v4  ;;  %v274_v38 = vpack.c.bf16 (!%p197_p2), %v273_v27, %v273_v27  ;;  %v296_v39 = vpack.c.bf16 (!%p197_p2), %v1199_v28, %v1199_v28  ;;  %v1207_v62 = vld [vmem:[%s1544_s1 + $0x18] sm:$0xff] (!%p197_p2) }
   0x8   : > { %s1299_s28 = smov (!%p197_p2), 127   ;;  %s1300_s29 = smov (!%p197_p2), 113   ;;  %vm1304_vm10 = vmmov (!%p197_p2), 0   ;;  %vm927_vm11 = vcmask (!%p197_p2), 64512  }
   0x9   : > { %s1301_s30 = smov (!%p197_p2), 112   ;;  %s1302_s6 = smov (!%p197_p2), 111   ;;  %v549_v6 = vsub.s32 (!%p197_p2), 4, %v1377_v5  ;;  %v263_v12 = vsub.s32 (!%p197_p2), 0, %v1377_v5  ;;  %v284_v13 = vsub.s32 (!%p197_p2), 1, %v1377_v5  ;;  %v408_v16 = vsub.s32 (!%p197_p2), 2, %v1377_v5 }
   0xa   : > { %vm258_vm0 = vcmp.lt.s32.totalorder (!%p197_p2), %v1392_v11, 17  ;;  %vm279_vm1 = vcmp.lt.s32.totalorder (!%p197_p2), %v1392_v11, 16  ;;  %vm403_vm3 = vcmp.lt.s32.totalorder (!%p197_p2), %v1392_v11, 15  ;;  %v482_v22 = vsub.s32 (!%p197_p2), 3, %v1377_v5 }
   0xb   : > { %v550_v9 = vrot.slane (!%p197_p2), %v1383_v7, %v549_v6  ;;  %v554_v10 = vrot.slane (!%p197_p2), %v1388_v8, %v549_v6  ;;  %v264_v18 = vrot.slane (!%p197_p2), %v1383_v7, %v263_v12  ;;  %v285_v19 = vrot.slane (!%p197_p2), %v1383_v7, %v284_v13 }
   0xc   : > { %v268_v20 = vrot.slane (!%p197_p2), %v1388_v8, %v263_v12  ;;  %v289_v21 = vrot.slane (!%p197_p2), %v1388_v8, %v284_v13  ;;  %v409_v25 = vrot.slane (!%p197_p2), %v1383_v7, %v408_v16  ;;  %v413_v26 = vrot.slane (!%p197_p2), %v1388_v8, %v408_v16 }
   0xd   : > { %s1550_s19 = smov (!%p228_p3, %s1189_s19), 1  ;;  %v557_v17 = vcombine.low %v550_v9, %v554_v10  ;;  %vm477_vm4 = vcmp.lt.s32.totalorder %v1392_v11, 1  ;;  %v483_v40 = vrot.slane %v1383_v7, %v482_v22  ;;  %v629_v41 = vsub.s32 5, %v1377_v5 }
   0xe   : > { %s1233_s20 = sshll.u32 %s1550_s19, 3  ;;  %v487_v50 = vrot.slane %v1388_v8, %v482_v22  ;;  %vm624_vm6 = vcmp.lt.s32.totalorder %v1392_v11, 127  ;;  %v703_v4 = vsub.s32 6, %v1377_v5  ;;  %v420_v13 = vpack.c.bf16 %v1204_v60, %v1204_v60  ;;  %v1216_v60 = vld [vmem:[%s1544_s1 + $0x30] sm:$0xff]  ;;  %s1234_s15 = sshll.u32 %s1550_s19, 4 }
   0xf   : > { %s232_s23 = scalar_lea.vmem %s1543_s0, %s1233_s20  ;;  %s236_s9 = scalar_lea.vmem %s1547_s4, %s1233_s20  ;;  %v630_v61 = vrot.slane %v1383_v7, %v629_v41  ;;  %v634_v12 = vrot.slane %v1388_v8, %v629_v41  ;;  %vm698_vm7 = vcmp.lt.s32.totalorder %v1392_v11, 113  ;;  %vm772_vm8 = vcmp.lt.s32.totalorder %v1392_v11, 112 }
  0x10   : > { %v1353_v0 = vld [vmem:[%s232_s23] sm:$0xff]  ;;  %v704_v22 = vrot.slane %v1383_v7, %v703_v4  ;;  %v708_v27 = vrot.slane %v1388_v8, %v703_v4  ;;  %vm846_vm9 = vcmp.lt.s32.totalorder %v1392_v11, 111  ;;  %s241_s20 = scalar_lea.vmem %s1548_s5, %s1234_s15 }
  0x11   : > { %252 = vrot.lane.b32.xlu1 %v1353_v0, %s1295_s24  ;;  %275 = vrot.lane.b32.xlu0 %v1353_v0, %s1296_s25  ;;  %v250_v2 = vcombine.high %v1353_v0, %v1353_v0  ;;  %v1374_v3 = vld [vmem:[%s236_s9] sm:$0xff]  ;;  %v1415_v29 = vmul.f32 %v557_v17, %v1353_v0 }
  0x13   : > { %v561_v51 = vcombine.high %v1415_v29, %v1415_v29 }
  0x15   : > { %254 = vrot.lane.b32.xlu1 %v250_v2, %s1295_s24  ;;  %277 = vrot.lane.b32.xlu0 %v250_v2, %s1296_s25 }
  0x19   : > { %401 = vrot.lane.b32.xlu1 %v250_v2, %s1297_s26  ;;  %399 = vrot.lane.b32.xlu0 %v1353_v0, %s1297_s26 }
  0x1d   : > { %475 = vrot.lane.b32.xlu1 %v250_v2, %s1298_s27  ;;  %473 = vrot.lane.b32.xlu0 %v1353_v0, %s1298_s27 }
  0x21   : > { %622 = vrot.lane.b32.xlu1 %v250_v2, %s1299_s28  ;;  %620 = vrot.lane.b32.xlu0 %v1353_v0, %s1299_s28 }
  0x25   : > { %696 = vrot.lane.b32.xlu1 %v250_v2, %s1300_s29  ;;  %694 = vrot.lane.b32.xlu0 %v1353_v0, %s1300_s29 }
  0x29   : > { %770 = vrot.lane.b32.xlu1 %v250_v2, %s1301_s30  ;;  %768 = vrot.lane.b32.xlu0 %v1353_v0, %s1301_s30 }
  0x2d   : > { %844 = vrot.lane.b32.xlu1 %v250_v2, %s1302_s6  ;;  %842 = vrot.lane.b32.xlu0 %v1353_v0, %s1302_s6  ;;  %v564_v2 = vpack.c.bf16 %v561_v51, %v561_v51 }
  0x31   : > { %918 = vperm.xlu0 %1270, %v1374_v3  }
  0x83   : > { %v253_v14 = vpop.permute.xlu1 %252  ;;  %v276_v15 = vpop.permute.xlu0 %275 }
  0x87   : > { %v255_v23 = vpop.permute.xlu1 %254  ;;  %v278_v24 = vpop.permute.xlu0 %277 }
  0x88   : > { %v259_v30 = vsel %vm258_vm0, %v253_v14, %v255_v23  ;;  %v260_v31 = vsel %vm258_vm0, %v255_v23, %v253_v14  ;;  %v280_v32 = vsel %vm279_vm1, %v276_v15, %v278_v24  ;;  %v281_v33 = vsel %vm279_vm1, %v278_v24, %v276_v15 }
  0x89   : > { %v269_v34 = vmul.f32 %v264_v18, %v260_v31  ;;  %v290_v35 = vmul.f32 %v285_v19, %v281_v33  ;;  %v270_v36 = vmul.f32 %v268_v20, %v259_v30  ;;  %v291_v37 = vmul.f32 %v289_v21, %v280_v32 }
  0x8a   : > { %v494_v14 = vpack.c.bf16 %v1207_v62, %v1207_v62  ;;  %v563_v19 = vpack.c.bf16 %v1415_v29, %v1415_v29  ;;  %v777_v23 = vsub.s32 7, %v1377_v5 }
  0x8b   : > { %v272_v42 = vpack.c.bf16 %v270_v36, %v270_v36  ;;  %v402_v43 = vpop.permute.xlu1 %401  ;;  %v293_v44 = vpack.c.bf16 %v291_v37, %v291_v37  ;;  %v400_v45 = vpop.permute.xlu0 %399  ;;  %v292_v46 = vpack.c.bf16 %v290_v35, %v290_v35  ;;  %v271_v47 = vpack.c.bf16 %v269_v34, %v269_v34 }
  0x8c   : > { %v404_v48 = vsel %vm403_vm3, %v400_v45, %v402_v43  ;;  %v405_v49 = vsel %vm403_vm3, %v402_v43, %v400_v45  ;;  %v572_v32 = vsel %vm301_vm2, %v563_v19, 0  ;;  %v778_v34 = vrot.slane %v1383_v7, %v777_v23  ;;  %v1213_v7 = vld [vmem:[%s1544_s1 + $0x28] sm:$0xff] }
  0x8d   : > { %1202 = vmatprep.subr.msk.bf16.mxu1 %vm301_vm2, %v272_v42  ;;  %1200 = vmatprep.subr.msk.bf16.mxu0 %vm301_vm2, %v293_v44  ;;  %v414_v52 = vmul.f32 %v409_v25, %v405_v49  ;;  %v415_v53 = vmul.f32 %v413_v26, %v404_v48  ;;  %v303_v54 = vsel %vm301_vm2, %v292_v46, 0  ;;  %v353_v55 = vsel %vm301_vm2, %v271_v47, 0  ;;  %v1222_v49 = vld [vmem:[%s1545_s2 + $0x10] ss:$0 sm:$0xff] }
  0x8e   : > { %309 = vmatpush1.bf16.msra.mxu0 %v303_v54  ;;  %359 = vmatpush1.bf16.msra.mxu1 %v353_v55  ;;  %v641_v48 = vpack.c.bf16 %v1213_v7, %v1213_v7 }
  0x8f   : > { %v416_v56 = vpack.c.bf16 %v414_v52, %v414_v52  ;;  %v417_v57 = vpack.c.bf16 %v415_v53, %v415_v53  ;;  %v476_v58 = vpop.permute.xlu1 %475  ;;  %v474_v59 = vpop.permute.xlu0 %473 }
  0x90   : > { %v478_v63 = vsel %vm477_vm4, %v474_v59, %v476_v58  ;;  %v479_v0 = vsel %vm477_vm4, %v476_v58, %v474_v59 }
  0x91   : > { %1203 = vmatmul.mubr.msk.bf16.vlgmr.msra.gmra.mrb[0].mxu1 %vm297_vm5, %v274_v38  ;;  %1201 = vmatmul.mubr.msk.bf16.vlgmr.msra.gmra.mrb[0].mxu0 %vm297_vm5, %v296_v39  ;;  %v488_v6 = vmul.f32 %v483_v40, %v479_v0  ;;  %v489_v9 = vmul.f32 %v487_v50, %v478_v63  ;;  %v425_v10 = vsel %vm301_vm2, %v416_v56, 0  ;;  %v1210_v38 = vld [vmem:[%s1544_s1 + $0x20] sm:$0xff]  ;;  %v782_v39 = vrot.slane %v1388_v8, %v777_v23  ;;  %v1223_v50 = vld [vmem:[%s1545_s2 + $0x18] ss:$0 sm:$0xff] }
  0x92   : > { %1205 = vmatprep.subr.msk.bf16.mxu0 %vm301_vm2, %v417_v57  ;;  %462 = vmatprep.mubr.bf16.mxu0 %v1294_v1  ;;  %v567_v44 = vpack.c.bf16 %v1210_v38, %v1210_v38  ;;  %v715_v0 = vpack.c.bf16 %v1216_v60, %v1216_v60 }
  0x93   : > { %v490_v15 = vpack.c.bf16 %v488_v6, %v488_v6  ;;  %v491_v16 = vpack.c.bf16 %v489_v9, %v489_v9  ;;  %431 = vmatpush1.bf16.msra.mxu0 %v425_v10  ;;  %v623_v17 = vpop.permute.xlu1 %622  ;;  %v621_v18 = vpop.permute.xlu0 %620  ;;  %536 = vmatprep.mubr.bf16.mxu1 %v1294_v1  ;;  %v1224_v6 = vld [vmem:[%s1544_s1 + $0x40] sm:$0xff]  ;;  %v1303_v10 = vmov 0.0  }
  0x94   : > { %v625_v20 = vsel %vm624_vm6, %v621_v18, %v623_v17  ;;  %v626_v21 = vsel %vm624_vm6, %v623_v17, %v621_v18  ;;  %1211 = vmatprep.subr.msk.bf16.mxu0 %vm301_vm2, %v564_v2  ;;  %v863_v9 = vpack.c.bf16 %v1224_v6, %v1224_v6 }
  0x95   : > { %1208 = vmatprep.subr.msk.bf16.mxu1 %vm301_vm2, %v491_v16  ;;  %v499_v24 = vsel %vm301_vm2, %v490_v15, 0  ;;  %v635_v25 = vmul.f32 %v630_v61, %v625_v20  ;;  %v636_v26 = vmul.f32 %v634_v12, %v626_v21  ;;  %v1219_v61 = vld [vmem:[%s1544_s1 + $0x38] sm:$0xff] }
  0x96   : > { %505 = vmatpush1.bf16.msra.mxu1 %v499_v24  ;;  %v789_v2 = vpack.c.bf16 %v1219_v61, %v1219_v61 }
  0x97   : > { %v637_v28 = vpack.c.bf16 %v635_v25, %v635_v25  ;;  %v638_v29 = vpack.c.bf16 %v636_v26, %v636_v26  ;;  %v697_v30 = vpop.permute.xlu1 %696  ;;  %v695_v31 = vpop.permute.xlu0 %694 }
  0x98   : > { %v699_v33 = vsel %vm698_vm7, %v695_v31, %v697_v30  ;;  %v700_v5 = vsel %vm698_vm7, %v697_v30, %v695_v31 }
  0x99   : > { %1206 = vmatmul.mubr.msk.bf16.vlgmr.msra.gmra.mrb[4].mxu0 %vm297_vm5, %v420_v13  ;;  %1209 = vmatmul.mubr.msk.bf16.vlgmr.msra.gmra.mrb[4].mxu1 %vm297_vm5, %v494_v14  ;;  %v709_v35 = vmul.f32 %v704_v22, %v699_v33  ;;  %v710_v36 = vmul.f32 %v708_v27, %v700_v5  ;;  %v646_v37 = vsel %vm301_vm2, %v637_v28, 0 }
  0x9a   : > { %578 = vmatpush1.bf16.msra.mxu0 %v572_v32  ;;  %1214 = vmatprep.subr.msk.bf16.mxu1 %vm301_vm2, %v638_v29 }
  0x9b   : > { %v711_v40 = vpack.c.bf16 %v709_v35, %v709_v35  ;;  %v712_v41 = vpack.c.bf16 %v710_v36, %v710_v36  ;;  %609 = vmatprep.mubr.bf16.mxu0 %v1294_v1  ;;  %652 = vmatpush1.bf16.msra.mxu1 %v646_v37  ;;  %v771_v42 = vpop.permute.xlu1 %770  ;;  %v769_v43 = vpop.permute.xlu0 %768 }
  0x9c   : > { %v773_v45 = vsel %vm772_vm8, %v769_v43, %v771_v42  ;;  %v774_v8 = vsel %vm772_vm8, %v771_v42, %v769_v43  ;;  %683 = vmatprep.mubr.bf16.mxu1 %v1294_v1 }
  0x9d   : > { %v783_v46 = vmul.f32 %v778_v34, %v773_v45  ;;  %v784_v47 = vmul.f32 %v782_v39, %v774_v8  ;;  %1217 = vmatprep.subr.msk.bf16.mxu0 %vm301_vm2, %v712_v41  ;;  %v720_v53 = vsel %vm301_vm2, %v711_v40, 0 }
  0x9f   : > { %v785_v51 = vpack.c.bf16 %v783_v46, %v783_v46  ;;  %v786_v52 = vpack.c.bf16 %v784_v47, %v784_v47  ;;  %v845_v54 = vpop.permute.xlu1 %844  ;;  %v843_v55 = vpop.permute.xlu0 %842 }
  0xa0   : > { %v847_v56 = vsel %vm846_vm9, %v843_v55, %v845_v54  ;;  %v848_v57 = vsel %vm846_vm9, %v845_v54, %v843_v55 }
  0xa1   : > { %1212 = vmatmul.mubr.msk.bf16.vlgmr.msra.gmra.mrb[8].mxu0 %vm297_vm5, %v567_v44  ;;  %1215 = vmatmul.mubr.msk.bf16.vlgmr.msra.gmra.mrb[8].mxu1 %vm297_vm5, %v641_v48  ;;  %v857_v11 = vmul.f32 %v1222_v49, %v847_v56  ;;  %v858_v58 = vmul.f32 %v1223_v50, %v848_v57  ;;  %v794_v59 = vsel %vm301_vm2, %v785_v51, 0 }
  0xa2   : > { %726 = vmatpush1.bf16.msra.mxu0 %v720_v53  ;;  %1220 = vmatprep.subr.msk.bf16.mxu1 %vm301_vm2, %v786_v52 }
  0xa3   : > { %v859_v62 = vpack.c.bf16 %v857_v11, %v857_v11  ;;  %v860_v63 = vpack.c.bf16 %v858_v58, %v858_v58  ;;  %757 = vmatprep.mubr.bf16.mxu0 %v1294_v1  ;;  %800 = vmatpush1.bf16.msra.mxu1 %v794_v59 }
  0xa4   : > { %831 = vmatprep.mubr.bf16.mxu1 %v1294_v1  ;;  %1239 = vmatprep.subr.mxu1 %v1303_v10 }
  0xa5   : > { %1225 = vmatprep.subr.msk.bf16.mxu0 %vm301_vm2, %v860_v63  ;;  %v868_v4 = vsel %vm301_vm2, %v859_v62, 0  ;;  %v923_v63 = vld [vmem:[%s1546_s3] sm:$0xff] }
  0xa9   : > { %1218 = vmatmul.mubr.msk.bf16.vlgmr.msra.gmra.mrb[12].mxu0 %vm297_vm5, %v715_v0  ;;  %1221 = vmatmul.mubr.msk.bf16.vlgmr.msra.gmra.mrb[12].mxu1 %vm297_vm5, %v789_v2 }
  0xaa   : > { %874 = vmatpush1.bf16.msra.mxu0 %v868_v4  ;;  %905 = vmatprep.mubr.bf16.mxu0 %v1294_v1 }
  0xab   : > { %1241 = vmatprep.mubr.msk.f32.mxu1 %vm1304_vm10, %v1303_v10 }
  0xb0   : > { %v919_v55 = vpop.permute.xlu0 %918 }
  0xb1   : > { %1226 = vmatmul.mubr.msk.bf16.vlgmr.msra.gmra.mrb[16].mxu0 %vm297_vm5, %v863_v9 }
 0x164   : > { %v342_v12 = vpop.f32.mrb[0].mxu0  ;;  %v392_v13 = vpop.f32.mrb[0].mxu1 }
 0x165   : > { %v393_v14 = vadd.f32 %v392_v13, %v342_v12  ;;  %v344_v15 = vpop.f32.mrb[1].mxu0  ;;  %v394_v16 = vpop.f32.mrb[1].mxu1 }
 0x166   : > { %v395_v17 = vadd.f32 %v394_v16, %v344_v15  ;;  %v346_v18 = vpop.f32.mrb[2].mxu0  ;;  %v396_v19 = vpop.f32.mrb[2].mxu1 }
 0x167   : > { %v347_v20 = vpop.f32.mrb[3].mxu0  ;;  %v397_v1 = vpop.f32.mrb[3].mxu1  ;;  %v1305_v18 = vmov 1  }
 0x16c   : > { %v464_v21 = vpop.f32.mrb[4].mxu0  ;;  %v538_v22 = vpop.f32.mrb[4].mxu1 }
 0x16d   : > { %v471_v23 = vadd.f32 %v464_v21, %v393_v14  ;;  %v466_v24 = vpop.f32.mrb[5].mxu0  ;;  %v540_v25 = vpop.f32.mrb[5].mxu1 }
 0x16e   : > { %v472_v26 = vadd.f32 %v466_v24, %v395_v17  ;;  %v468_v27 = vpop.f32.mrb[6].mxu0  ;;  %v542_v28 = vpop.f32.mrb[6].mxu1 }
 0x16f   : > { %v545_v29 = vadd.f32 %v538_v22, %v471_v23  ;;  %v469_v30 = vpop.f32.mrb[7].mxu0  ;;  %v543_v31 = vpop.f32.mrb[7].mxu1 }
 0x170   : > { %v546_v32 = vadd.f32 %v540_v25, %v472_v26 }
 0x174   : > { %v611_v33 = vpop.f32.mrb[8].mxu0  ;;  %v685_v5 = vpop.f32.mrb[8].mxu1 }
 0x175   : > { %v618_v34 = vadd.f32 %v611_v33, %v545_v29  ;;  %v613_v35 = vpop.f32.mrb[9].mxu0  ;;  %v687_v36 = vpop.f32.mrb[9].mxu1 }
 0x176   : > { %v619_v37 = vadd.f32 %v613_v35, %v546_v32  ;;  %v615_v38 = vpop.f32.mrb[10].mxu0  ;;  %v689_v39 = vpop.f32.mrb[10].mxu1 }
 0x177   : > { %v692_v7 = vadd.f32 %v685_v5, %v618_v34  ;;  %v616_v40 = vpop.f32.mrb[11].mxu0  ;;  %v690_v41 = vpop.f32.mrb[11].mxu1 }
 0x178   : > { %v693_v42 = vadd.f32 %v687_v36, %v619_v37 }
 0x17c   : > { %v759_v43 = vpop.f32.mrb[12].mxu0  ;;  %v833_v44 = vpop.f32.mrb[12].mxu1 }
 0x17d   : > { %v766_v45 = vadd.f32 %v759_v43, %v692_v7  ;;  %v761_v8 = vpop.f32.mrb[13].mxu0  ;;  %v835_v46 = vpop.f32.mrb[13].mxu1 }
 0x17e   : > { %v767_v47 = vadd.f32 %v761_v8, %v693_v42  ;;  %v763_v48 = vpop.f32.mrb[14].mxu0  ;;  %v837_v49 = vpop.f32.mrb[14].mxu1 }
 0x17f   : > { %v840_v50 = vadd.f32 %v833_v44, %v766_v45  ;;  %v764_v51 = vpop.f32.mrb[15].mxu0  ;;  %v838_v52 = vpop.f32.mrb[15].mxu1 }
 0x180   : > { %v841_v53 = vadd.f32 %v835_v46, %v767_v47 }
 0x184   : > { %v907_v54 = vpop.f32.mrb[16].mxu0 }
 0x185   : > { %v914_v56 = vadd.f32 %v907_v54, %v840_v50  ;;  %v909_v57 = vpop.f32.mrb[17].mxu0 }
 0x186   : > { %v915_v11 = vadd.f32 %v909_v57, %v841_v53  ;;  %v911_v58 = vpop.f32.mrb[18].mxu0 }
 0x187   : > { %v921_v59 = vadd.f32 %v919_v55, %v914_v56  ;;  %v912_v60 = vpop.f32.mrb[19].mxu0 }
 0x188   : > { %v922_v61 = vadd.f32 %v919_v55, %v915_v11 }
 0x18a   : > { %v924_v62 = vadd.f32 %v922_v61, %v921_v59 }
 0x18c   : > { %925 = vadd.xlane.f32.xlu1 %v924_v62 }
 0x219   : > { %v926_v0 = vpop.xlane.xlu1 %925 }
 0x21a   : > { %1240 = vmatpush3.msra.mxu1 %v926_v0 }
 0x21b   : > { %1242 = vmatmul.mubr.msk.f32.vlgmr.msra.gmra.mrb[16].mxu1 %vm927_vm11, %v923_v63  ;;  %1244 = vmatprep.subr.mxu1 %v1303_v10 }
 0x21c   : > { %1246 = vmatprep.mubr.msk.f32.mxu1 %vm1304_vm10, %v1303_v10  ;;  %v1306_v10 = vmov 2  }
 0x2ee   : > { %v997_v2 = vpop.f32.mrb[16].mxu1 }
 0x2ef   : > { %v1001_v4 = vmul.f32 0.001953125, %v997_v2  ;;  %v1243_v6 = vpop.f32.mrb[17].mxu1 }
 0x2f1   : > { %1004 = vperm.xlu0 %1270, %v1001_v4  }
 0x2f5   : > { %1272 = vset.pattern.permute.xlu0 %v1305_v18 }
 0x370   : > { %v1005_v9 = vpop.permute.xlu0 %1004 }
 0x371   : > { %v1007_v12 = vsub.f32 %v921_v59, %v1005_v9  ;;  %v1008_v13 = vsub.f32 %v922_v61, %v1005_v9 }
 0x373   : > { %v1009_v14 = vmul.f32 %v1007_v12, %v1007_v12  ;;  %v1010_v15 = vmul.f32 %v1008_v13, %v1008_v13 }
 0x375   : > { %v1011_v16 = vadd.f32 %v1010_v15, %v1009_v14 }
 0x377   : > { %1012 = vadd.xlane.f32.xlu0 %v1011_v16 }
 0x38d   : > { %1095 = vperm.xlu0 %1272, %v1374_v3  }
 0x391   : > { %1274 = vset.pattern.permute.xlu0 %v1306_v10 }
 0x404   : > { %v1013_v17 = vpop.xlane.xlu0 %1012 }
 0x405   : > { %1245 = vmatpush3.msra.mxu1 %v1013_v17 }
 0x406   : > { %1247 = vmatmul.mubr.msk.f32.vlgmr.msra.gmra.mrb[18].mxu1 %vm927_vm11, %v923_v63 }
 0x40c   : > { %v1096_v24 = vpop.permute.xlu0 %1095 }
 0x4d9   : > { %v1080_v19 = vpop.f32.mrb[18].mxu1 }
 0x4da   : > { %v1084_v20 = vmul.f32 0.001953125, %v1080_v19  ;;  %v1248_v1 = vpop.f32.mrb[19].mxu1 }
 0x4dc   : > { %v1085_v21 = vadd.f32 1e-05, %v1084_v20 }
 0x4de   : > { %1276 = vrsqrt.f32 %v1085_v21 }
 0x4e8   : > { %v1277_v22 = vpop.eup %1276 }
 0x4e9   : > { %1089 = vperm.xlu1 %1271, %v1277_v22  }
 0x4ed   : > { %1273 = vset.pattern.permute.xlu1 %v1306_v10 }
 0x4ee   : > { %1101 = vperm.xlu1 %1273, %v1374_v3  }
 0x568   : > { %v1090_v23 = vpop.permute.xlu1 %1089 }
 0x569   : > { %v1092_v25 = vmul.f32 %v1090_v23, %v1007_v12  ;;  %v1093_v26 = vmul.f32 %v1090_v23, %v1008_v13 }
 0x56b   : > { %v1098_v27 = vmul.f32 %v1096_v24, %v1092_v25  ;;  %v1099_v28 = vmul.f32 %v1096_v24, %v1093_v26 }
 0x56d   : > { %v1102_v29 = vpop.permute.xlu1 %1101 }
 0x56e   : > { %v1104_v30 = vadd.f32 %v1102_v29, %v1098_v27  ;;  %v1105_v31 = vadd.f32 %v1102_v29, %v1099_v28 }
 0x570   : > { %v1229_v32 = vmul.f32 -1.442695, %v1104_v30  ;;  %v1230_v33 = vmul.f32 -1.442695, %v1105_v31 }
 0x572   : > { %1278 = vpow2.f32 %v1229_v32 }
 0x573   : > { %1280 = vpow2.f32 %v1230_v33 }
 0x57c   : > { %v1279_v5 = vpop.eup %1278 }
 0x57d   : > { %v1281_v34 = vpop.eup %1280  ;;  %v1112_v35 = vadd.f32 1.0, %v1279_v5 }
 0x57e   : > { %v1113_v36 = vadd.f32 1.0, %v1281_v34 }
 0x57f   : > { %1282 = vrcp.f32 %v1112_v35 }
 0x580   : > { %1284 = vrcp.f32 %v1113_v36 }
 0x589   : > { %v1283_v3 = vpop.eup %1282 }
 0x58a   : > { %v1285_v37 = vpop.eup %1284  ;;  %v1118_v38 = vmul.f32 %v1283_v3, %v1104_v30 }
 0x58b   : > { %v1119_v39 = vmul.f32 %v1285_v37, %v1105_v31 }
 0x58c   : > { %1120 = vst [vmem:[%s241_s20] sm:$0xff] %v1118_v38 }
 0x58d   : > { %1121 = vst [vmem:[%s241_s20 + $0x8] sm:$0xff] %v1119_v39 }
 0x58e PF: > { %s15_s18 = sadd.s32 1, %s1292_s18  }
 0x58f   : > { %p12_p4 = scmp.ge.s32.totalorder %s15_s18, 4  }
 0x591   :  { %14 = sbr.rel (!%p12_p4) target bundleno = 1 (0x1), region = 81 }

</bundles_post_ra>
